<compile_context>
chip_gen: v6e
topology: v6e:2x2x1
jax: 0.10.0
libtpu: 0.0.40
codegen_flags: <defaults>
</compile_context>

<pallas_src>
import jax
import jax.numpy as jnp
from jax.experimental import pallas as pl
from jax.experimental.pallas import tpu as pltpu


def _adaptive_linear_kernel(x_ref, w_ref, b_ref, o_ref):
    # x_ref: (TB, K=C*L), w_ref: (K, N), b_ref: (1, N), o_ref: (TB, N)
    y = jnp.dot(x_ref[...], w_ref[...], preferred_element_type=jnp.float32)
    o_ref[...] = (y + b_ref[...]).astype(o_ref.dtype)


def _choose_batch_tile(B, K, bytes_per_elem=4, target_bytes=2 << 20):
    """Pick a batch tile so one x block is ~2 MiB (multiple of 8 rows)."""
    tb = (target_bytes // max(K * bytes_per_elem, 1)) // 8 * 8
    tb = max(tb, 8)
    tb = min(tb, 1024)
    if B <= tb:
        return B          # whole batch fits in one block
    return tb


def adaptive_linear(x, weight, bias):
    """x: (B, 32, L) f32; weight: (num_classes, 32); bias: (num_classes,)."""
    B, C, L = x.shape
    num_classes = weight.shape[0]
    assert weight.shape == (num_classes, C)

    K = C * L
    # Fold AdaptiveAvgPool1d(1) (mean over L) + Linear into one contraction:
    #   y[b, n] = sum_{c,l} x[b, c, l] * W[n, c] / L
    # Row c*L + l of W_eff matches the (C, L) -> C*L reshape of x.
    w_eff = jnp.repeat(weight.T / jnp.float32(L), L, axis=0)   # (K, N)
    b2 = bias.reshape(1, num_classes).astype(jnp.float32)      # 2-D for VMEM
    x2d = x.reshape(B, K)

    TB = _choose_batch_tile(B, K)

    # Pad the batch so it divides evenly into TB-row blocks.
    B_pad = pl.cdiv(B, TB) * TB
    if B_pad != B:
        x2d = jnp.pad(x2d, ((0, B_pad - B), (0, 0)))

    out = pl.pallas_call(
        _adaptive_linear_kernel,
        out_shape=jax.ShapeDtypeStruct((B_pad, num_classes), jnp.float32),
        grid_spec=pltpu.PrefetchScalarGridSpec(
            num_scalar_prefetch=0,
            grid=(B_pad // TB,),
            in_specs=[
                # x: streamed per batch tile (double-buffered by Pallas).
                pl.BlockSpec((TB, K), lambda i: (i, 0)),
                # weight / bias: constant index map -> stay VMEM-resident.
                pl.BlockSpec((K, num_classes), lambda i: (0, 0)),
                pl.BlockSpec((1, num_classes), lambda i: (0, 0)),
            ],
            out_specs=pl.BlockSpec((TB, num_classes), lambda i: (i, 0)),
        ),
        compiler_params=pltpu.CompilerParams(
            # Batch tiles are independent -> shard across cores on v7x.
            dimension_semantics=("parallel",),
        ),
    )(x2d, w_eff, b2)

    if B_pad != B:
        out = out[:B]
    return out


if __name__ == "__main__":
    num_classes = 10
    B, C, L = 2, 32, 16  # Linear(32, num_classes) forces C=32

    key = jax.random.PRNGKey(0)
    kx, kw, kb = jax.random.split(key, 3)

    x = jax.random.normal(kx, (B, C, L), dtype=jnp.float32)

    # Deterministic "PyTorch-like" init: U(-1/sqrt(C), 1/sqrt(C))
    bound = 1.0 / (C ** 0.5)
    weight = jax.random.uniform(kw, (num_classes, C), jnp.float32, -bound, bound)
    bias = jax.random.uniform(kb, (num_classes,), jnp.float32, -bound, bound)

    out = adaptive_linear(x, weight, bias)
    out = jax.block_until_ready(out)

    # Reference check in plain JAX (mean-pool then linear, as in PyTorch).
    ref = jnp.mean(x, axis=-1) @ weight.T + bias
    assert out.shape == (B, num_classes)
    assert jnp.allclose(out, ref, atol=1e-5, rtol=1e-5), "mismatch vs reference"

    print("KERNEL_OK")
</pallas_src>

<mosaic_0001>
module attributes {stable_mosaic.version = 11 : i64} {
  func.func @_adaptive_linear_kernel(%arg0: i32, %arg1: memref<2x512xf32, #tpu.memory_space<vmem>>, %arg2: memref<512x10xf32, #tpu.memory_space<vmem>>, %arg3: memref<1x10xf32, #tpu.memory_space<vmem>>, %arg4: memref<2x10xf32, #tpu.memory_space<vmem>>) attributes {dimension_semantics = [#tpu.dimension_semantics<parallel>], iteration_bounds = array<i64: 1>, scalar_prefetch = 0 : i64, scratch_operands = 0 : i64, tpu.core_type = #tpu.core_type<tc>, window_params = [{transform_indices = @transform_0, window_bounds = array<i64: 2, 512>}, {pipeline_mode = #tpu.pipeline_mode<synchronous>, transform_indices = @transform_1, window_bounds = array<i64: 512, 10>}, {pipeline_mode = #tpu.pipeline_mode<synchronous>, transform_indices = @transform_2, window_bounds = array<i64: 1, 10>}, {transform_indices = @transform_3, window_bounds = array<i64: 2, 10>}]} {
    %c0 = arith.constant 0 : index
    %c0_0 = arith.constant 0 : index
    %0 = vector.load %arg1[%c0, %c0_0] : memref<2x512xf32, #tpu.memory_space<vmem>>, vector<2x512xf32>
    %c0_1 = arith.constant 0 : index
    %c0_2 = arith.constant 0 : index
    %1 = vector.load %arg2[%c0_1, %c0_2] : memref<512x10xf32, #tpu.memory_space<vmem>>, vector<512x10xf32>
    %cst = arith.constant dense<0.000000e+00> : vector<2x10xf32>
    %2 = tpu.matmul %0, %1, %cst {dimension_numbers = #tpu.dot_dimension_numbers<[1], [0], [0], [1], [0, 0, 1, 1], [], []>} : vector<2x512xf32>, vector<512x10xf32>, vector<2x10xf32> -> vector<2x10xf32>
    %c0_3 = arith.constant 0 : index
    %c0_4 = arith.constant 0 : index
    %3 = vector.load %arg3[%c0_3, %c0_4] : memref<1x10xf32, #tpu.memory_space<vmem>>, vector<1x10xf32>
    %4 = vector.broadcast %3 : vector<1x10xf32> to vector<2x10xf32>
    %5 = arith.addf %2, %4 : vector<2x10xf32>
    %c0_5 = arith.constant 0 : index
    %c0_6 = arith.constant 0 : index
    %6 = vector.load %arg4[%c0_5, %c0_6] : memref<2x10xf32, #tpu.memory_space<vmem>>, vector<2x10xf32>
    tpu.vector_store %arg4[%c0_5, %c0_6], %5 {strides = array<i32>} : memref<2x10xf32, #tpu.memory_space<vmem>>, vector<2x10xf32>,
    return
  }
  func.func @transform_0(%arg0: i32) -> (i32, i32) {
    %c0_i32 = arith.constant 0 : i32
    %c0_i32_0 = arith.constant 0 : i32
    return %arg0, %c0_i32 : i32, i32
  }
  func.func @transform_1(%arg0: i32) -> (i32, i32) {
    %c0_i32 = arith.constant 0 : i32
    %c0_i32_0 = arith.constant 0 : i32
    %c0_i32_1 = arith.constant 0 : i32
    return %c0_i32, %c0_i32_0 : i32, i32
  }
  func.func @transform_2(%arg0: i32) -> (i32, i32) {
    %c0_i32 = arith.constant 0 : i32
    %c0_i32_0 = arith.constant 0 : i32
    %c0_i32_1 = arith.constant 0 : i32
    return %c0_i32, %c0_i32_0 : i32, i32
  }
  func.func @transform_3(%arg0: i32) -> (i32, i32) {
    %c0_i32 = arith.constant 0 : i32
    %c0_i32_0 = arith.constant 0 : i32
    return %arg0, %c0_i32 : i32, i32
  }
}

</mosaic_0001>

<bundles_post_ra>
// kernel: tpu_custom_call.1
= control target key start
LH: loop header
LB: loop body
LE: loop exit
PB: predicated region body
PF: predicated region fallthrough
CT: control target
= control target key end

     0   :  { %v361_v30 = vmov 1983009808   ;;  %v92_v32 = vlaneseq  ;;  %s584_s0 = inlined_call_operand.vmem [shape: f32[2,512], index: 0, kind: input, shape index: {}]   ;;  %s585_s1 = inlined_call_operand.vmem [shape: f32[512,10], index: 1, kind: input, shape index: {}]   ;;  %s586_s2 = inlined_call_operand.vmem [shape: f32[1,10], index: 2, kind: input, shape index: {}]   ;;  %s587_s3 = inlined_call_operand.hbm [shape: f32[2,10], index: 3, kind: output, shape index: {}]  }
   0x1   :  { %v47_v0 = vld [vmem:[%s585_s1 + $0xf8] sm:$0xff]  ;;  %v46_v4 = vld [vmem:[%s585_s1 + $0xf0] sm:$0xff]  ;;  %v45_v8 = vld [vmem:[%s585_s1 + $0xe8] sm:$0xff]  ;;  %v90_v31 = vunpack.c.l.s4 %v361_v30 }
   0x2   :  { %v79_v1 = vld [vmem:[%s585_s1 + $0x1f8] sm:$0xff]  ;;  %266 = vmatprep.subr.mxu0 %v47_v0  ;;  %v78_v5 = vld [vmem:[%s585_s1 + $0x1f0] sm:$0xff]  ;;  %v77_v9 = vld [vmem:[%s585_s1 + $0x1e8] sm:$0xff]  ;;  %v93_v42 = vshrl.u32 %v92_v32, 7 }
   0x3   :  { %v31_v2 = vld [vmem:[%s585_s1 + $0x78] sm:$0xff]  ;;  %301 = vmatprep.subr.mxu1 %v79_v1  ;;  %v30_v6 = vld [vmem:[%s585_s1 + $0x70] sm:$0xff]  ;;  %v29_v10 = vld [vmem:[%s585_s1 + $0x68] sm:$0xff]  ;;  %v91_v41 = vunpack.c.0.s8 %v90_v31 }
   0x4   :  { %v63_v3 = vld [vmem:[%s585_s1 + $0x178] sm:$0xff]  ;;  %267 = vmatpush3.msra.mxu0 %v31_v2  ;;  %v62_v7 = vld [vmem:[%s585_s1 + $0x170] sm:$0xff]  ;;  %v61_v11 = vld [vmem:[%s585_s1 + $0x168] sm:$0xff] }
   0x5   :  { %302 = vmatpush3.msra.mxu1 %v63_v3  ;;  %268 = vmatprep.subr.mxu0 %v46_v4  ;;  %v44_v12 = vld [vmem:[%s585_s1 + $0xe0] sm:$0xff]  ;;  %v43_v16 = vld [vmem:[%s585_s1 + $0xd8] sm:$0xff]  ;;  %v42_v20 = vld [vmem:[%s585_s1 + $0xd0] sm:$0xff]  ;;  %v94_v52 = vsub.s32 %v91_v41, %v93_v42 }
   0x6   :  { %303 = vmatprep.subr.mxu1 %v78_v5  ;;  %269 = vmatpush3.msra.mxu0 %v30_v6  ;;  %v76_v13 = vld [vmem:[%s585_s1 + $0x1e0] sm:$0xff]  ;;  %v75_v17 = vld [vmem:[%s585_s1 + $0x1d8] sm:$0xff]  ;;  %v74_v21 = vld [vmem:[%s585_s1 + $0x1d0] sm:$0xff] }
   0x7   :  { %304 = vmatpush3.msra.mxu1 %v62_v7  ;;  %270 = vmatprep.subr.mxu0 %v45_v8  ;;  %v28_v14 = vld [vmem:[%s585_s1 + $0x60] sm:$0xff]  ;;  %v27_v18 = vld [vmem:[%s585_s1 + $0x58] sm:$0xff]  ;;  %v26_v22 = vld [vmem:[%s585_s1 + $0x50] sm:$0xff] }
   0x8   :  { %305 = vmatprep.subr.mxu1 %v77_v9  ;;  %v60_v15 = vld [vmem:[%s585_s1 + $0x160] sm:$0xff]  ;;  %271 = vmatpush3.msra.mxu0 %v29_v10  ;;  %v59_v19 = vld [vmem:[%s585_s1 + $0x158] sm:$0xff]  ;;  %v58_v23 = vld [vmem:[%s585_s1 + $0x150] sm:$0xff] }
   0x9   :  { %306 = vmatpush3.msra.mxu1 %v61_v11  ;;  %272 = vmatprep.subr.mxu0 %v44_v12  ;;  %v41_v24 = vld [vmem:[%s585_s1 + $0xc8] sm:$0xff]  ;;  %v40_v28 = vld [vmem:[%s585_s1 + $0xc0] sm:$0xff]  ;;  %v39_v35 = vld [vmem:[%s585_s1 + $0xb8] sm:$0xff] }
   0xa   :  { %307 = vmatprep.subr.mxu1 %v76_v13  ;;  %273 = vmatpush3.msra.mxu0 %v28_v14  ;;  %v73_v25 = vld [vmem:[%s585_s1 + $0x1c8] sm:$0xff]  ;;  %v72_v29 = vld [vmem:[%s585_s1 + $0x1c0] sm:$0xff]  ;;  %v71_v36 = vld [vmem:[%s585_s1 + $0x1b8] sm:$0xff] }
   0xb   :  { %308 = vmatpush3.msra.mxu1 %v60_v15  ;;  %274 = vmatprep.subr.mxu0 %v43_v16  ;;  %v25_v26 = vld [vmem:[%s585_s1 + $0x48] sm:$0xff]  ;;  %v24_v33 = vld [vmem:[%s585_s1 + $0x40] sm:$0xff]  ;;  %v23_v37 = vld [vmem:[%s585_s1 + $0x38] sm:$0xff] }
   0xc   :  { %309 = vmatprep.subr.mxu1 %v75_v17  ;;  %275 = vmatpush3.msra.mxu0 %v27_v18  ;;  %v57_v27 = vld [vmem:[%s585_s1 + $0x148] sm:$0xff]  ;;  %v56_v34 = vld [vmem:[%s585_s1 + $0x140] sm:$0xff]  ;;  %v55_v38 = vld [vmem:[%s585_s1 + $0x138] sm:$0xff] }
   0xd   :  { %310 = vmatpush3.msra.mxu1 %v59_v19  ;;  %276 = vmatprep.subr.mxu0 %v42_v20  ;;  %v38_v39 = vld [vmem:[%s585_s1 + $0xb0] sm:$0xff]  ;;  %v37_v45 = vld [vmem:[%s585_s1 + $0xa8] sm:$0xff]  ;;  %v36_v49 = vld [vmem:[%s585_s1 + $0xa0] sm:$0xff] }
   0xe   :  { %311 = vmatprep.subr.mxu1 %v74_v21  ;;  %277 = vmatpush3.msra.mxu0 %v26_v22  ;;  %v70_v40 = vld [vmem:[%s585_s1 + $0x1b0] sm:$0xff]  ;;  %v69_v46 = vld [vmem:[%s585_s1 + $0x1a8] sm:$0xff]  ;;  %v68_v50 = vld [vmem:[%s585_s1 + $0x1a0] sm:$0xff] }
   0xf   :  { %312 = vmatpush3.msra.mxu1 %v58_v23  ;;  %278 = vmatprep.subr.mxu0 %v41_v24  ;;  %v22_v43 = vld [vmem:[%s585_s1 + $0x30] sm:$0xff]  ;;  %v21_v47 = vld [vmem:[%s585_s1 + $0x28] sm:$0xff]  ;;  %v20_v51 = vld [vmem:[%s585_s1 + $0x20] sm:$0xff] }
  0x10   :  { %313 = vmatprep.subr.mxu1 %v73_v25  ;;  %279 = vmatpush3.msra.mxu0 %v25_v26  ;;  %v54_v44 = vld [vmem:[%s585_s1 + $0x130] sm:$0xff]  ;;  %v53_v48 = vld [vmem:[%s585_s1 + $0x128] sm:$0xff]  ;;  %v52_v53 = vld [vmem:[%s585_s1 + $0x120] sm:$0xff] }
  0x11   :  { %314 = vmatpush3.msra.mxu1 %v57_v27  ;;  %280 = vmatprep.subr.mxu0 %v40_v28  ;;  %v15_v54 = vld [vmem:[%s584_s0] sm:$0xff] }
  0x12   :  { %315 = vmatprep.subr.mxu1 %v72_v29  ;;  %281 = vmatpush3.msra.mxu0 %v24_v33 }
  0x13   :  { %316 = vmatpush3.msra.mxu1 %v56_v34  ;;  %282 = vmatprep.subr.mxu0 %v39_v35 }
  0x14   :  { %317 = vmatprep.subr.mxu1 %v71_v36  ;;  %283 = vmatpush3.msra.mxu0 %v23_v37 }
  0x15   :  { %318 = vmatpush3.msra.mxu1 %v55_v38  ;;  %284 = vmatprep.subr.mxu0 %v38_v39 }
  0x16   :  { %319 = vmatprep.subr.mxu1 %v70_v40  ;;  %285 = vmatpush3.msra.mxu0 %v22_v43 }
  0x17   :  { %320 = vmatpush3.msra.mxu1 %v54_v44  ;;  %286 = vmatprep.subr.mxu0 %v37_v45 }
  0x18   :  { %321 = vmatprep.subr.mxu1 %v69_v46 }
  0x19   :  { %8 = vsyncpa [#allocation3], 0  ;;  %287 = vmatpush3.msra.mxu0 %v21_v47  ;;  %322 = vmatpush3.msra.mxu1 %v53_v48  ;;  %v35_v55 = vld [vmem:[%s585_s1 + $0x98] sm:$0xff]  ;;  %v88_v57 = vcombine.high %v15_v54, %v15_v54  ;;  %v34_v60 = vld [vmem:[%s585_s1 + $0x90] sm:$0xff]  ;;  %v95_v62 = vrot.slane %v15_v54, %v94_v52  ;;  %s362_s8 = smov [#allocation2]   ;;  %vm249_vm0 = vcmask 74752  }
  0x1a   :  { %v67_v56 = vld [vmem:[%s585_s1 + $0x198] sm:$0xff]  ;;  %288 = vmatprep.subr.mxu0 %v36_v49  ;;  %323 = vmatprep.subr.mxu1 %v68_v50  ;;  %v66_v61 = vld [vmem:[%s585_s1 + $0x190] sm:$0xff]  ;;  %v33_v2 = vld [vmem:[%s585_s1 + $0x88] sm:$0xff]  ;;  %s257_s0 = sshll.u32 %s362_s8, 4  ;;  %s258_s0 = int_to_ptr.vmem [resolvable:$true] %s257_s0 }
  0x1b   :  { %v19_v58 = vld [vmem:[%s585_s1 + $0x18] sm:$0xff]  ;;  %289 = vmatpush3.msra.mxu0 %v20_v51  ;;  %324 = vmatpush3.msra.mxu1 %v52_v53  ;;  %v18_v63 = vld [vmem:[%s585_s1 + $0x10] sm:$0xff]  ;;  %v102_v1 = vrot.slane %v88_v57, %v94_v52  ;;  %v65_v3 = vld [vmem:[%s585_s1 + $0x188] sm:$0xff]  ;;  %v103_v8 = vcombine.high %v95_v62, %v95_v62  ;;  %p344_p1 = scmp.lt.s32.totalorder %s258_s0, %s258_s0 }
  0x1c   :  { %v51_v59 = vld [vmem:[%s585_s1 + $0x118] sm:$0xff]  ;;  %290 = vmatprep.subr.mxu0 %v35_v55  ;;  %325 = vmatprep.subr.mxu1 %v67_v56  ;;  %v50_v0 = vld [vmem:[%s585_s1 + $0x110] sm:$0xff]  ;;  %v17_v4 = vld [vmem:[%s585_s1 + $0x8] sm:$0xff] }
  0x1d   :  { %291 = vmatpush3.msra.mxu0 %v19_v58  ;;  %326 = vmatpush3.msra.mxu1 %v51_v59  ;;  %v49_v5 = vld [vmem:[%s585_s1 + $0x108] sm:$0xff]  ;;  %v32_v6 = vld [vmem:[%s585_s1 + $0x80] sm:$0xff]  ;;  %v104_v10 = vcombine.high %v102_v1, %v102_v1 }
  0x1e   :  { %292 = vmatprep.subr.mxu0 %v34_v60  ;;  %327 = vmatprep.subr.mxu1 %v66_v61  ;;  %v64_v7 = vld [vmem:[%s585_s1 + $0x180] sm:$0xff] }
  0x1f   :  { %293 = vmatpush3.msra.mxu0 %v18_v63  ;;  %328 = vmatpush3.msra.mxu1 %v50_v0  ;;  %v16_v9 = vld [vmem:[%s585_s1] sm:$0xff] }
  0x20   :  { %294 = vmatprep.subr.mxu0 %v33_v2  ;;  %329 = vmatprep.subr.mxu1 %v65_v3  ;;  %v48_v11 = vld [vmem:[%s585_s1 + $0x100] sm:$0xff]  ;;  %s339_s1 = scalar_lea.vmem %s258_s0, 32 }
  0x21   :  { %295 = vmatpush3.msra.mxu0 %v17_v4  ;;  %330 = vmatpush3.msra.mxu1 %v49_v5  ;;  %v265_v14 = vld [vmem:[%s586_s2] ss:$0 sm:$0xff]  ;;  %p340_p0 = scmp.ne.s32.totalorder %s258_s0, %s339_s1  ;;  %p345_p2 = scmp.lt.s32.totalorder %s339_s1, %s339_s1 }
  0x22   :  { %296 = vmatprep.subr.mxu0 %v32_v6  ;;  %331 = vmatprep.subr.mxu1 %v64_v7 }
  0x23   :  { %297 = vmatpush3.msra.mxu0 %v16_v9  ;;  %173 = vmatprep.mubr.f32.mxu0 %v103_v8  ;;  %p346_p3 = por %p345_p2, %p344_p1 }
  0x24   :  { %332 = vmatpush3.msra.mxu1 %v48_v11  ;;  %243 = vmatprep.mubr.f32.mxu1 %v104_v10 }
  0x25   :  { %174 = vmatmul.mubr.f32.vlgmr.msra.gmra.mxu0 %v95_v62  ;;  %244 = vmatmul.mubr.f32.vlgmr.msra.gmra.mxu1 %v102_v1  ;;  %p347_p4 = pnand %p346_p3, %p340_p0 }
  0xe5   :  { %v298_v12 = vpop.f32.mrf.mxu0  ;;  %v333_v13 = vpop.f32.mrf.mxu1 }
  0xe7   :  { %v299_v15 = vpop.f32.mrf.mxu0  ;;  %v334_v16 = vpop.f32.mrf.mxu1 }
  0xe8   :  { %v300_v17 = vadd.f32 %v299_v15, %v298_v12  ;;  %v335_v19 = vadd.f32 %v334_v16, %v333_v13 }
  0xea   :  { %v176_v18 = vadd.f32 %v300_v17, %v265_v14 }
  0xec   :  { %v246_v20 = vadd.f32 %v335_v19, %v176_v18 }
  0xee   :  { %250 = vst.msk [vmem:[#allocation2] sm:$0x3] %vm249_vm0, %v246_v20 }
  0xef   :  { %350 = shalt.err (!%p347_p4)
}
  0xf0   :  { %260 = dma.vmem_to_hbm [thread:$0]  %s258_s0, 32, %s587_s3, [#allocation3]  }
  0xf1   :  { %359 = dma.done.wait [#allocation3], 32  }
  0xf2   :  { %360 = vsyncadd [#allocation3], 4294967264 }
  0xf3   :  { %264 = vsyncpa [#allocation3], 1 }

</bundles_post_ra>
